<compile_context>
chip_gen: v7x
topology: tpu7x:2x2x1
jax: 0.10.0
libtpu: 0.0.40
codegen_flags: <defaults>
</compile_context>

<pallas_src>
import jax
import jax.numpy as jnp
from jax.experimental import pallas as pl
from jax.experimental.pallas import tpu as pltpu


_LANE = 128                      # lane width / MXU-friendly padding granularity
_M_ALIGN = 16                    # row granularity (native bf16 sublane tile)
_TILE_M_MAX = 1024               # upper bound on the streamed row tile
_VMEM_LIMIT = 32 * 1024 * 1024   # explicit scoped-VMEM budget (fits v5e/v6e/v7x)


def _round_up(x, m):
    return (x + m - 1) // m * m


def _gemm_bias_relu_kernel(p_ref, w_ref, b_ref, o_ref):
    # p_ref: (tile_m, Kp) bf16 patch tile   (streamed per grid step)
    # w_ref: (Kp, Np)     bf16 weights      (grid-invariant -> resident)
    # b_ref: (1, Np)      f32 bias          (grid-invariant -> resident)
    # o_ref: (tile_m, Np) f32/bf16 output tile (lane-dense: Np % 128 == 0)
    acc = jnp.dot(p_ref[...], w_ref[...], preferred_element_type=jnp.float32)
    acc = acc + b_ref[...]
    o_ref[...] = jnp.maximum(acc, 0.0).astype(o_ref.dtype)


def _pick_tile_m(M, Kp, Np):
    """Largest M tile (multiple of 16, <= _TILE_M_MAX) such that the
    double-buffered bf16 patch tile + double-buffered output tile plus the
    resident bf16 weight / f32 bias stay inside the VMEM budget."""
    resident = Kp * Np * 2 + Np * 4                 # bf16 weight + f32 bias
    per_row = 2 * (Kp * 2) + 2 * (Np * 4)           # 2x patch bufs + 2x out bufs (f32 worst case)
    budget = (_VMEM_LIMIT * 3) // 4 - resident
    cap = _M_ALIGN
    if budget > 0:
        cap = max(_M_ALIGN, (budget // per_row) // _M_ALIGN * _M_ALIGN)
    return int(min(_TILE_M_MAX, cap, _round_up(M, _M_ALIGN)))


def _gemm_bias_relu(patches, w, bias, tile_m, out_dtype):
    """patches: (Mp, Kp) bf16, w: (Kp, Np) bf16, bias: (1, Np) f32 -> (Mp, Np).

    Requires Mp % tile_m == 0, Kp % 128 == 0, Np % 128 == 0 (wrapper pads).
    """
    Mp, Kp = patches.shape
    Np = w.shape[1]
    grid_m = Mp // tile_m
    out_bytes = jnp.dtype(out_dtype).itemsize
    cost = pl.CostEstimate(
        flops=2 * Mp * Kp * Np,
        transcendentals=0,
        bytes_accessed=Mp * Kp * 2 + Kp * Np * 2 + Np * 4 + Mp * Np * out_bytes,
    )
    return pl.pallas_call(
        _gemm_bias_relu_kernel,
        out_shape=jax.ShapeDtypeStruct((Mp, Np), out_dtype),
        grid_spec=pltpu.PrefetchScalarGridSpec(
            num_scalar_prefetch=0,
            grid=(grid_m,),
            in_specs=[
                pl.BlockSpec((tile_m, Kp), lambda i: (i, 0)),  # streamed rows
                pl.BlockSpec((Kp, Np), lambda i: (0, 0)),      # resident weight
                pl.BlockSpec((1, Np), lambda i: (0, 0)),       # resident bias
            ],
            out_specs=pl.BlockSpec((tile_m, Np), lambda i: (i, 0)),
        ),
        compiler_params=pltpu.CompilerParams(
            dimension_semantics=("parallel",),   # megacore-shard M on v7x
            vmem_limit_bytes=_VMEM_LIMIT,
        ),
        cost_estimate=cost,
    )(patches, w, bias)


def _im2col_nhwc(x, k, stride, pad):
    """x: (B, H, W, C) NHWC -> ((B*OH*OW, k*k*C), OH, OW).

    K-axis layout is (ki, kj, cin) — matches a torch weight transposed to HWIO
    and flattened.  Channels stay on the minor (lane) axis so each slice is
    lane-contiguous for DMA.  Dtype of x (bf16) is preserved so the replicated
    patch matrix hits HBM at half width.
    """
    B, H, W, C = x.shape
    xp = jnp.pad(x, ((0, 0), (pad, pad), (pad, pad), (0, 0)))
    OH = (H - k + 2 * pad) // stride + 1
    OW = (W - k + 2 * pad) // stride + 1
    cols = []
    for i in range(k):
        for j in range(k):
            cols.append(
                xp[:, i : i + stride * OH : stride, j : j + stride * OW : stride, :]
            )
    p = jnp.concatenate(cols, axis=-1)                 # (B, OH, OW, k*k*C)
    return p.reshape(B * OH * OW, k * k * C), OH, OW


class Conv2dEncoderPallas:
    """JAX/Pallas port of emote.nn.layers.Conv2dEncoder (ReLU activation)."""

    def __init__(
        self,
        input_shape,          # (H, W, C) if channels_last else (C, H, W)
        channels,
        kernels,
        strides,
        padding,
        channels_last=True,
        flatten=True,
        key=None,
    ):
        self._channels_last = channels_last
        if channels_last:
            self._img_shape_cwh = [input_shape[2], input_shape[0], input_shape[1]]
        else:
            self._img_shape_cwh = list(input_shape)
        self._channels = list(channels)
        self._kernels = list(kernels)
        self._strides = list(strides)
        self._padding = list(padding)
        self.flatten = flatten

        in_out = [self._img_shape_cwh[0]] + list(channels)
        if key is None:
            key = jax.random.PRNGKey(0)
        # TODO(synk): ortho_init_ (orthogonal init) is a parameter-init detail
        # only; a scaled-normal stand-in is used (forward semantics unchanged).
        self.weights = []   # torch layout: (Cout, Cin, k, k)
        self.biases = []    # (Cout,)
        for i in range(len(channels)):
            key, wk = jax.random.split(key)
            cin, cout, k = in_out[i], in_out[i + 1], kernels[i]
            fan_in = cin * k * k
            w = jax.random.normal(wk, (cout, cin, k, k), jnp.float32) / jnp.sqrt(
                jnp.float32(fan_in)
            )
            self.weights.append(w)
            self.biases.append(jnp.zeros((cout,), jnp.float32))

        # Pre-pack weights once: OIHW -> HWIO -> (k*k*Cin, Cout), zero-padded
        # to (Kp, Np) multiples of 128, cast to bf16 for the MXU.
        self._w_packed = []
        self._b_packed = []
        for w, b in zip(self.weights, self.biases):
            cout, cin, k, _ = w.shape
            K = cin * k * k
            Kp = _round_up(K, _LANE)
            Np = _round_up(cout, _LANE)
            w2 = jnp.transpose(w, (2, 3, 1, 0)).reshape(K, cout)
            w2 = jnp.pad(w2, ((0, Kp - K), (0, Np - cout))).astype(jnp.bfloat16)
            b2 = jnp.pad(b, (0, Np - cout)).reshape(1, Np).astype(jnp.float32)
            self._w_packed.append(w2)
            self._b_packed.append(b2)

        self._forward = jax.jit(self._forward_impl)

    def _forward_impl(self, obs):
        x = obs
        if not self._channels_last:
            # Module receives NCHW; work internally in NHWC (channels on lanes).
            x = jnp.transpose(x, (0, 2, 3, 1))
        B = x.shape[0]
        # MXU operands are bf16 anyway; casting up-front halves the HBM bytes
        # of the k*k-replicated patch matrices (the dominant traffic).
        x = x.astype(jnp.bfloat16)

        n_layers = len(self._channels)
        for li in range(n_layers):
            k = self._kernels[li]
            s = self._strides[li]
            p = self._padding[li]
            cout = self._channels[li]
            w2 = self._w_packed[li]          # (Kp, Np) bf16
            b2 = self._b_packed[li]          # (1, Np)  f32
            Kp, Np = w2.shape

            patches, OH, OW = _im2col_nhwc(x, k, s, p)   # (M, K) bf16
            M, K = patches.shape
            tile_m = _pick_tile_m(M, Kp, Np)
            Mp = _round_up(M, tile_m)
            patches = jnp.pad(patches, ((0, Mp - M), (0, Kp - K)))

            # Intermediate activations stay bf16 in HBM (they only feed the
            # next bf16 matmul); the final layer emits f32 to match torch.
            out_dtype = jnp.float32 if li == n_layers - 1 else jnp.bfloat16
            out2d = _gemm_bias_relu(patches, w2, b2, tile_m, out_dtype)
            x = out2d[:M, :cout].reshape(B, OH, OW, cout)   # next NHWC act

        # Single layout fix-up so the result matches torch exactly
        # (NCHW tensor / NCHW flatten order).
        x = jnp.transpose(x, (0, 3, 1, 2))
        if self.flatten:
            x = x.reshape(B, -1)
        return x

    def __call__(self, obs):
        return self._forward(obs)

    def get_encoder_output_size(self):
        cx, cy = self._img_shape_cwh[1], self._img_shape_cwh[2]
        for k, s, p in zip(self._kernels, self._strides, self._padding):
            cx = (cx - k + 2 * p) // s + 1
            cy = (cy - k + 2 * p) // s + 1
        out = (self._channels[-1], cx, cy)
        if self.flatten:
            out = int(out[0] * out[1] * out[2])
        return out


def _reference_forward(enc, obs):
    """Pure-JAX f32 reference using lax.conv for the correctness check."""
    x = jnp.transpose(obs, (0, 3, 1, 2)) if enc._channels_last else obs
    for li in range(len(enc._channels)):
        k, s, p = enc._kernels[li], enc._strides[li], enc._padding[li]
        x = jax.lax.conv_general_dilated(
            x, enc.weights[li],
            window_strides=(s, s),
            padding=[(p, p), (p, p)],
            dimension_numbers=("NCHW", "OIHW", "NCHW"),
        ) + enc.biases[li][None, :, None, None]
        x = jnp.maximum(x, 0.0)
    if enc.flatten:
        x = x.reshape(x.shape[0], -1)
    return x


if __name__ == "__main__":
    key = jax.random.PRNGKey(0)
    k_obs, k_params = jax.random.split(key)

    # Small, module-consistent shapes: batch=2, 16x16 image with 4 channels
    # (channels_last), two conv layers.
    B, H, W, C = 2, 16, 16, 4
    input_shape = (H, W, C)
    channels = [8, 8]
    kernels = [3, 3]
    strides = [2, 2]
    padding = [1, 1]

    enc = Conv2dEncoderPallas(
        input_shape, channels, kernels, strides, padding,
        channels_last=True, flatten=True, key=k_params,
    )

    obs = jax.random.normal(k_obs, (B, H, W, C), jnp.float32)

    out = enc(obs)
    out = jax.block_until_ready(out)

    # Sanity checks against the analytical output size and a lax.conv reference.
    assert out.shape == (B, enc.get_encoder_output_size()), out.shape
    ref = jax.block_until_ready(_reference_forward(enc, obs))
    # bf16 MXU operands / bf16 intermediate activations vs f32 reference.
    assert jnp.allclose(out, ref, atol=5e-2, rtol=5e-2), float(
        jnp.max(jnp.abs(out - ref))
    )

    print("KERNEL_OK")
</pallas_src>

<mosaic_0001>
module attributes {stable_mosaic.version = 11 : i64} {
  func.func @_gemm_bias_relu_kernel(%arg0: i32, %arg1: memref<128x128xbf16, #tpu.memory_space<vmem>>, %arg2: memref<128x128xbf16, #tpu.memory_space<vmem>>, %arg3: memref<1x128xf32, #tpu.memory_space<vmem>>, %arg4: memref<128x128xbf16, #tpu.memory_space<vmem>>) attributes {dimension_semantics = [#tpu.dimension_semantics<parallel>], iteration_bounds = array<i64: 1>, scalar_prefetch = 0 : i64, scratch_operands = 0 : i64, tpu.core_type = #tpu.core_type<tc>, window_params = [{transform_indices = @transform_0, window_bounds = array<i64: 128, 128>}, {pipeline_mode = #tpu.pipeline_mode<synchronous>, transform_indices = @transform_1, window_bounds = array<i64: 128, 128>}, {pipeline_mode = #tpu.pipeline_mode<synchronous>, transform_indices = @transform_2, window_bounds = array<i64: 1, 128>}, {transform_indices = @transform_3, window_bounds = array<i64: 128, 128>}]} {
    %c0 = arith.constant 0 : index
    %c0_0 = arith.constant 0 : index
    %0 = vector.load %arg1[%c0, %c0_0] : memref<128x128xbf16, #tpu.memory_space<vmem>>, vector<128x128xbf16>
    %c0_1 = arith.constant 0 : index
    %c0_2 = arith.constant 0 : index
    %1 = vector.load %arg2[%c0_1, %c0_2] : memref<128x128xbf16, #tpu.memory_space<vmem>>, vector<128x128xbf16>
    %cst = arith.constant dense<0.000000e+00> : vector<128x128xf32>
    %2 = tpu.matmul %0, %1, %cst {dimension_numbers = #tpu.dot_dimension_numbers<[1], [0], [0], [1], [0, 0, 1, 1], [], []>} : vector<128x128xbf16>, vector<128x128xbf16>, vector<128x128xf32> -> vector<128x128xf32>
    %c0_3 = arith.constant 0 : index
    %c0_4 = arith.constant 0 : index
    %3 = vector.load %arg3[%c0_3, %c0_4] : memref<1x128xf32, #tpu.memory_space<vmem>>, vector<1x128xf32>
    %4 = vector.broadcast %3 : vector<1x128xf32> to vector<128x128xf32>
    %5 = arith.addf %2, %4 : vector<128x128xf32>
    %cst_5 = arith.constant 0.000000e+00 : f32
    %6 = vector.broadcast %cst_5 : f32 to vector<128x128xf32>
    %7 = arith.maximumf %5, %6 : vector<128x128xf32>
    %8 = arith.truncf %7 : vector<128x128xf32> to vector<128x128xbf16>
    %c0_6 = arith.constant 0 : index
    %c0_7 = arith.constant 0 : index
    %9 = vector.load %arg4[%c0_6, %c0_7] : memref<128x128xbf16, #tpu.memory_space<vmem>>, vector<128x128xbf16>
    tpu.vector_store %arg4[%c0_6, %c0_7], %8 {strides = array<i32>} : memref<128x128xbf16, #tpu.memory_space<vmem>>, vector<128x128xbf16>,
    return
  }
  func.func @transform_0(%arg0: i32) -> (i32, i32) {
    %c0_i32 = arith.constant 0 : i32
    %c0_i32_0 = arith.constant 0 : i32
    return %arg0, %c0_i32 : i32, i32
  }
  func.func @transform_1(%arg0: i32) -> (i32, i32) {
    %c0_i32 = arith.constant 0 : i32
    %c0_i32_0 = arith.constant 0 : i32
    %c0_i32_1 = arith.constant 0 : i32
    return %c0_i32, %c0_i32_0 : i32, i32
  }
  func.func @transform_2(%arg0: i32) -> (i32, i32) {
    %c0_i32 = arith.constant 0 : i32
    %c0_i32_0 = arith.constant 0 : i32
    %c0_i32_1 = arith.constant 0 : i32
    return %c0_i32, %c0_i32_0 : i32, i32
  }
  func.func @transform_3(%arg0: i32) -> (i32, i32) {
    %c0_i32 = arith.constant 0 : i32
    %c0_i32_0 = arith.constant 0 : i32
    return %arg0, %c0_i32 : i32, i32
  }
}

module attributes {stable_mosaic.version = 11 : i64} {
  func.func @_gemm_bias_relu_kernel(%arg0: i32, %arg1: memref<32x128xbf16, #tpu.memory_space<vmem>>, %arg2: memref<128x128xbf16, #tpu.memory_space<vmem>>, %arg3: memref<1x128xf32, #tpu.memory_space<vmem>>, %arg4: memref<32x128xf32, #tpu.memory_space<vmem>>) attributes {dimension_semantics = [#tpu.dimension_semantics<parallel>], iteration_bounds = array<i64: 1>, scalar_prefetch = 0 : i64, scratch_operands = 0 : i64, tpu.core_type = #tpu.core_type<tc>, window_params = [{transform_indices = @transform_0, window_bounds = array<i64: 32, 128>}, {pipeline_mode = #tpu.pipeline_mode<synchronous>, transform_indices = @transform_1, window_bounds = array<i64: 128, 128>}, {pipeline_mode = #tpu.pipeline_mode<synchronous>, transform_indices = @transform_2, window_bounds = array<i64: 1, 128>}, {transform_indices = @transform_3, window_bounds = array<i64: 32, 128>}]} {
    %c0 = arith.constant 0 : index
    %c0_0 = arith.constant 0 : index
    %0 = vector.load %arg1[%c0, %c0_0] : memref<32x128xbf16, #tpu.memory_space<vmem>>, vector<32x128xbf16>
    %c0_1 = arith.constant 0 : index
    %c0_2 = arith.constant 0 : index
    %1 = vector.load %arg2[%c0_1, %c0_2] : memref<128x128xbf16, #tpu.memory_space<vmem>>, vector<128x128xbf16>
    %cst = arith.constant dense<0.000000e+00> : vector<32x128xf32>
    %2 = tpu.matmul %0, %1, %cst {dimension_numbers = #tpu.dot_dimension_numbers<[1], [0], [0], [1], [0, 0, 1, 1], [], []>} : vector<32x128xbf16>, vector<128x128xbf16>, vector<32x128xf32> -> vector<32x128xf32>
    %c0_3 = arith.constant 0 : index
    %c0_4 = arith.constant 0 : index
    %3 = vector.load %arg3[%c0_3, %c0_4] : memref<1x128xf32, #tpu.memory_space<vmem>>, vector<1x128xf32>
    %4 = vector.broadcast %3 : vector<1x128xf32> to vector<32x128xf32>
    %5 = arith.addf %2, %4 : vector<32x128xf32>
    %cst_5 = arith.constant 0.000000e+00 : f32
    %6 = vector.broadcast %cst_5 : f32 to vector<32x128xf32>
    %7 = arith.maximumf %5, %6 : vector<32x128xf32>
    %c0_6 = arith.constant 0 : index
    %c0_7 = arith.constant 0 : index
    %8 = vector.load %arg4[%c0_6, %c0_7] : memref<32x128xf32, #tpu.memory_space<vmem>>, vector<32x128xf32>
    tpu.vector_store %arg4[%c0_6, %c0_7], %7 {strides = array<i32>} : memref<32x128xf32, #tpu.memory_space<vmem>>, vector<32x128xf32>,
    return
  }
  func.func @transform_0(%arg0: i32) -> (i32, i32) {
    %c0_i32 = arith.constant 0 : i32
    %c0_i32_0 = arith.constant 0 : i32
    return %arg0, %c0_i32 : i32, i32
  }
  func.func @transform_1(%arg0: i32) -> (i32, i32) {
    %c0_i32 = arith.constant 0 : i32
    %c0_i32_0 = arith.constant 0 : i32
    %c0_i32_1 = arith.constant 0 : i32
    return %c0_i32, %c0_i32_0 : i32, i32
  }
  func.func @transform_2(%arg0: i32) -> (i32, i32) {
    %c0_i32 = arith.constant 0 : i32
    %c0_i32_0 = arith.constant 0 : i32
    %c0_i32_1 = arith.constant 0 : i32
    return %c0_i32, %c0_i32_0 : i32, i32
  }
  func.func @transform_3(%arg0: i32) -> (i32, i32) {
    %c0_i32 = arith.constant 0 : i32
    %c0_i32_0 = arith.constant 0 : i32
    return %arg0, %c0_i32 : i32, i32
  }
}

</mosaic_0001>

<bundles_post_ra>
// kernel: _forward_impl.2
= control target key start
LH: loop header
LB: loop body
LE: loop exit
PB: predicated region body
PF: predicated region fallthrough
CT: control target
= control target key end

     0   :  { %s618_s1 = inlined_call_operand.vmem [shape: bf16[128,128], index: 1, kind: input, shape index: {}]   ;;  %s619_s0 = inlined_call_operand.vmem [shape: bf16[128,128], index: 0, kind: input, shape index: {}]   ;;  %s620_s2 = inlined_call_operand.vmem [shape: f32[1,128], index: 2, kind: input, shape index: {}]   ;;  %s621_s3 = inlined_call_operand.vmem [shape: bf16[128,128], index: 3, kind: output, shape index: {}]  }
   0x1   :  { %v507_v0 = vld [vmem:[%s618_s1] sm:$0xff]   ;;  %v508_v1 = vld [vmem:[%s618_s1 + $0x8] sm:$0xff]   ;;  %v509_v2 = vld [vmem:[%s618_s1 + $0x10] sm:$0xff]  }
   0x2   :  { %459 = vmatprep.subr.bf16.mxu0 %v507_v0  ;;  %491 = vmatprep.subr.bf16.mxu1 %v507_v0  ;;  %v510_v3 = vld [vmem:[%s618_s1 + $0x18] sm:$0xff]   ;;  %v515_v4 = vld [vmem:[%s619_s0] sm:$0xff]   ;;  %v512_v7 = vld [vmem:[%s618_s1 + $0x28] sm:$0xff]  }
   0x3   :  { %460 = vmatpush3.bf16.msra.mxu0 %v507_v0  ;;  %499 = vmatpush3.bf16.msra.mxu1 %v507_v0  ;;  %v516_v5 = vld [vmem:[%s619_s0 + $0x20] sm:$0xff]   ;;  %v513_v8 = vld [vmem:[%s618_s1 + $0x30] sm:$0xff]   ;;  %v514_v9 = vld [vmem:[%s618_s1 + $0x38] sm:$0xff]  }
   0x4   :  { %461 = vmatprep.subr.bf16.mxu0 %v508_v1  ;;  %492 = vmatprep.subr.bf16.mxu1 %v508_v1  ;;  %v511_v6 = vld [vmem:[%s618_s1 + $0x20] sm:$0xff]   ;;  %v517_v10 = vld [vmem:[%s619_s0 + $0x8] sm:$0xff]   ;;  %v519_v12 = vld [vmem:[%s619_s0 + $0x10] sm:$0xff]  }
   0x5   :  { %475 = vmatprep.mubr.bf16.mxu0 %v515_v4  ;;  %483 = vmatprep.mubr.bf16.mxu1 %v516_v5  ;;  %v518_v11 = vld [vmem:[%s619_s0 + $0x28] sm:$0xff]   ;;  %v520_v13 = vld [vmem:[%s619_s0 + $0x30] sm:$0xff]   ;;  %v521_v14 = vld [vmem:[%s619_s0 + $0x18] sm:$0xff]  }
   0x6   :  { %v522_v15 = vld [vmem:[%s619_s0 + $0x38] sm:$0xff]   ;;  %v347_v16 = vld [vmem:[%s620_s2] ss:$0 sm:$0xff] }
   0x7   :  { %462 = vmatpush3.bf16.msra.mxu0 %v508_v1  ;;  %500 = vmatpush3.bf16.msra.mxu1 %v508_v1 }
   0x8   :  { %463 = vmatprep.subr.bf16.mxu0 %v509_v2  ;;  %493 = vmatprep.subr.bf16.mxu1 %v509_v2 }
   0xb   :  { %464 = vmatpush3.bf16.msra.mxu0 %v509_v2  ;;  %501 = vmatpush3.bf16.msra.mxu1 %v509_v2 }
   0xc   :  { %465 = vmatprep.subr.bf16.mxu0 %v510_v3  ;;  %494 = vmatprep.subr.bf16.mxu1 %v510_v3 }
   0xf   :  { %466 = vmatpush3.bf16.msra.mxu0 %v510_v3  ;;  %502 = vmatpush3.bf16.msra.mxu1 %v510_v3 }
  0x10   :  { %467 = vmatprep.subr.bf16.mxu0 %v511_v6  ;;  %495 = vmatprep.subr.bf16.mxu1 %v511_v6 }
  0x13   :  { %468 = vmatpush3.bf16.msra.mxu0 %v511_v6  ;;  %503 = vmatpush3.bf16.msra.mxu1 %v511_v6 }
  0x14   :  { %469 = vmatprep.subr.bf16.mxu0 %v512_v7  ;;  %496 = vmatprep.subr.bf16.mxu1 %v512_v7 }
  0x17   :  { %470 = vmatpush3.bf16.msra.mxu0 %v512_v7  ;;  %504 = vmatpush3.bf16.msra.mxu1 %v512_v7 }
  0x18   :  { %471 = vmatprep.subr.bf16.mxu0 %v513_v8  ;;  %497 = vmatprep.subr.bf16.mxu1 %v513_v8 }
  0x1b   :  { %472 = vmatpush3.bf16.msra.mxu0 %v513_v8  ;;  %505 = vmatpush3.bf16.msra.mxu1 %v513_v8 }
  0x1c   :  { %473 = vmatprep.subr.bf16.mxu0 %v514_v9  ;;  %498 = vmatprep.subr.bf16.mxu1 %v514_v9 }
  0x1f   :  { %474 = vmatpush3.bf16.msra.mxu0 %v514_v9  ;;  %506 = vmatpush3.bf16.msra.mxu1 %v514_v9 }
  0x22   :  { %476 = vmatmul.mubr.bf16.vlgmr.msra.gmra.mrb[0].mxu0 %v517_v10  ;;  %484 = vmatmul.mubr.bf16.vlgmr.msra.gmra.mrb[0].mxu1 %v518_v11 }
  0x23   :  { %479 = vmatprep.mubr.bf16.mxu0 %v519_v12  ;;  %487 = vmatprep.mubr.bf16.mxu1 %v520_v13 }
  0x2a   :  { %480 = vmatmul.mubr.bf16.gmra.mrb[4].mxu0 %v521_v14  ;;  %488 = vmatmul.mubr.bf16.gmra.mrb[4].mxu1 %v522_v15 }
  0xf5   :  { %v477_v17 = vpop.f32.mrb[0].mxu0  ;;  %v485_v18 = vpop.f32.mrb[0].mxu1 }
  0xf6   :  { %v193_v19 = vadd.f32 %v477_v17, %v347_v16  ;;  %v225_v20 = vadd.f32 %v485_v18, %v347_v16  ;;  %v184_v21 = vpop.f32.mrb[1].mxu0  ;;  %v216_v22 = vpop.f32.mrb[1].mxu1 }
  0xf7   :  { %v185_v23 = vadd.f32 %v347_v16, %v184_v21  ;;  %v217_v24 = vadd.f32 %v347_v16, %v216_v22  ;;  %v478_v25 = vpop.f32.mrb[2].mxu0  ;;  %v486_v26 = vpop.f32.mrb[2].mxu1 }
  0xf8   :  { %v196_v27 = vadd.f32 %v478_v25, %v347_v16  ;;  %v228_v28 = vadd.f32 %v486_v26, %v347_v16  ;;  %v187_v29 = vpop.f32.mrb[3].mxu0  ;;  %v219_v30 = vpop.f32.mrb[3].mxu1  ;;  %v249_v33 = vmax.f32 %v193_v19, 0.0  ;;  %v257_v34 = vmax.f32 %v225_v20, 0.0 }
  0xf9   :  { %v188_v31 = vadd.f32 %v347_v16, %v187_v29  ;;  %v220_v32 = vadd.f32 %v347_v16, %v219_v30  ;;  %v247_v37 = vmax.f32 %v185_v23, 0.0  ;;  %v255_v38 = vmax.f32 %v217_v24, 0.0 }
  0xfa   :  { %v250_v35 = vmax.f32 %v196_v27, 0.0  ;;  %v258_v36 = vmax.f32 %v228_v28, 0.0 }
  0xfb   :  { %v248_v39 = vmax.f32 %v188_v31, 0.0  ;;  %v256_v40 = vmax.f32 %v220_v32, 0.0 }
  0xfc   :  { %v404_v41 = vpack.c.bf16 %v250_v35, %v249_v33  ;;  %v424_v42 = vpack.c.bf16 %v258_v36, %v257_v34 }
  0xfd   :  { %v399_v43 = vpack.c.bf16 %v248_v39, %v247_v37  ;;  %v419_v44 = vpack.c.bf16 %v256_v40, %v255_v38  ;;  %v481_v45 = vpop.f32.mrb[4].mxu0  ;;  %v489_v46 = vpop.f32.mrb[4].mxu1 }
  0xfe   :  { %436 = vst [vmem:[%s621_s3 + $0x8] sm:$0xff] %v404_v41   ;;  %440 = vst [vmem:[%s621_s3 + $0x28] sm:$0xff] %v424_v42   ;;  %v209_v47 = vadd.f32 %v481_v45, %v347_v16  ;;  %v241_v48 = vadd.f32 %v489_v46, %v347_v16  ;;  %v200_v49 = vpop.f32.mrb[5].mxu0  ;;  %v232_v50 = vpop.f32.mrb[5].mxu1 }
  0xff   :  { %400 = vst [vmem:[%s621_s3] sm:$0xff] %v399_v43   ;;  %439 = vst [vmem:[%s621_s3 + $0x20] sm:$0xff] %v419_v44   ;;  %v201_v51 = vadd.f32 %v347_v16, %v200_v49  ;;  %v233_v52 = vadd.f32 %v347_v16, %v232_v50  ;;  %v482_v53 = vpop.f32.mrb[6].mxu0  ;;  %v490_v54 = vpop.f32.mrb[6].mxu1 }
 0x100   :  { %v212_v55 = vadd.f32 %v482_v53, %v347_v16  ;;  %v244_v56 = vadd.f32 %v490_v54, %v347_v16  ;;  %v203_v57 = vpop.f32.mrb[7].mxu0  ;;  %v235_v58 = vpop.f32.mrb[7].mxu1  ;;  %v253_v61 = vmax.f32 %v209_v47, 0.0  ;;  %v261_v62 = vmax.f32 %v241_v48, 0.0 }
 0x101   :  { %v204_v59 = vadd.f32 %v347_v16, %v203_v57  ;;  %v236_v60 = vadd.f32 %v347_v16, %v235_v58  ;;  %v251_v1 = vmax.f32 %v201_v51, 0.0  ;;  %v259_v2 = vmax.f32 %v233_v52, 0.0 }
 0x102   :  { %v254_v63 = vmax.f32 %v212_v55, 0.0  ;;  %v262_v0 = vmax.f32 %v244_v56, 0.0 }
 0x103   :  { %v252_v3 = vmax.f32 %v204_v59, 0.0  ;;  %v260_v4 = vmax.f32 %v236_v60, 0.0 }
 0x104   :  { %v414_v5 = vpack.c.bf16 %v254_v63, %v253_v61  ;;  %v434_v6 = vpack.c.bf16 %v262_v0, %v261_v62 }
 0x105   :  { %v409_v7 = vpack.c.bf16 %v252_v3, %v251_v1  ;;  %v429_v8 = vpack.c.bf16 %v260_v4, %v259_v2 }
 0x106   :  { %438 = vst [vmem:[%s621_s3 + $0x18] sm:$0xff] %v414_v5   ;;  %442 = vst [vmem:[%s621_s3 + $0x38] sm:$0xff] %v434_v6  }
 0x107   :  { %437 = vst [vmem:[%s621_s3 + $0x10] sm:$0xff] %v409_v7   ;;  %441 = vst [vmem:[%s621_s3 + $0x30] sm:$0xff] %v429_v8  }

// kernel: _forward_impl.3
= control target key start
LH: loop header
LB: loop body
LE: loop exit
PB: predicated region body
PF: predicated region fallthrough
CT: control target
= control target key end

     0   :  { %s279_s1 = inlined_call_operand.vmem [shape: bf16[128,128], index: 1, kind: input, shape index: {}]   ;;  %s280_s0 = inlined_call_operand.vmem [shape: bf16[32,128], index: 0, kind: input, shape index: {}]   ;;  %s281_s2 = inlined_call_operand.vmem [shape: f32[1,128], index: 2, kind: input, shape index: {}]   ;;  %s282_s3 = inlined_call_operand.vmem [shape: f32[32,128], index: 3, kind: output, shape index: {}]  }
   0x1   :  { %v204_v0 = vld [vmem:[%s279_s1] sm:$0xff]   ;;  %v205_v1 = vld [vmem:[%s279_s1 + $0x8] sm:$0xff]   ;;  %v206_v2 = vld [vmem:[%s279_s1 + $0x10] sm:$0xff]  }
   0x2   :  { %184 = vmatprep.subr.bf16.mxu0 %v204_v0  ;;  %v207_v3 = vld [vmem:[%s279_s1 + $0x18] sm:$0xff]   ;;  %v212_v4 = vld [vmem:[%s280_s0] sm:$0xff]   ;;  %v209_v6 = vld [vmem:[%s279_s1 + $0x28] sm:$0xff]  }
   0x3   :  { %185 = vmatpush3.bf16.msra.mxu0 %v204_v0  ;;  %200 = vmatprep.mubr.bf16.mxu0 %v212_v4  ;;  %v208_v5 = vld [vmem:[%s279_s1 + $0x20] sm:$0xff]   ;;  %v210_v7 = vld [vmem:[%s279_s1 + $0x30] sm:$0xff]   ;;  %v211_v8 = vld [vmem:[%s279_s1 + $0x38] sm:$0xff]  }
   0x4   :  { %186 = vmatprep.subr.bf16.mxu0 %v205_v1  ;;  %v213_v9 = vld [vmem:[%s280_s0 + $0x8] sm:$0xff]   ;;  %v163_v10 = vld [vmem:[%s281_s2] ss:$0 sm:$0xff] }
   0x7   :  { %187 = vmatpush3.bf16.msra.mxu0 %v205_v1 }
   0x8   :  { %188 = vmatprep.subr.bf16.mxu0 %v206_v2 }
   0xb   :  { %189 = vmatpush3.bf16.msra.mxu0 %v206_v2 }
   0xc   :  { %190 = vmatprep.subr.bf16.mxu0 %v207_v3 }
   0xf   :  { %191 = vmatpush3.bf16.msra.mxu0 %v207_v3 }
  0x10   :  { %192 = vmatprep.subr.bf16.mxu0 %v208_v5 }
  0x13   :  { %193 = vmatpush3.bf16.msra.mxu0 %v208_v5 }
  0x14   :  { %194 = vmatprep.subr.bf16.mxu0 %v209_v6 }
  0x17   :  { %195 = vmatpush3.bf16.msra.mxu0 %v209_v6 }
  0x18   :  { %196 = vmatprep.subr.bf16.mxu0 %v210_v7 }
  0x1b   :  { %197 = vmatpush3.bf16.msra.mxu0 %v210_v7 }
  0x1c   :  { %198 = vmatprep.subr.bf16.mxu0 %v211_v8 }
  0x1f   :  { %199 = vmatpush3.bf16.msra.mxu0 %v211_v8 }
  0x22   :  { %201 = vmatmul.mubr.bf16.vlgmr.msra.gmra.mrb[0].mxu0 %v213_v9 }
  0xf5   :  { %v202_v11 = vpop.f32.mrb[0].mxu0 }
  0xf6   :  { %v145_v12 = vadd.f32 %v202_v11, %v163_v10  ;;  %v136_v13 = vpop.f32.mrb[1].mxu0 }
  0xf7   :  { %v137_v14 = vadd.f32 %v163_v10, %v136_v13  ;;  %v203_v15 = vpop.f32.mrb[2].mxu0 }
  0xf8   :  { %v153_v16 = vmax.f32 %v145_v12, 0.0  ;;  %v148_v17 = vadd.f32 %v203_v15, %v163_v10  ;;  %v139_v18 = vpop.f32.mrb[3].mxu0 }
  0xf9   :  { %v151_v19 = vmax.f32 %v137_v14, 0.0  ;;  %v140_v20 = vadd.f32 %v163_v10, %v139_v18 }
  0xfa   :  { %157 = vst [vmem:[%s282_s3 + $0x10] sm:$0xff] %v153_v16  ;;  %v154_v21 = vmax.f32 %v148_v17, 0.0 }
  0xfb   :  { %155 = vst [vmem:[%s282_s3] sm:$0xff] %v151_v19  ;;  %v152_v22 = vmax.f32 %v140_v20, 0.0 }
  0xfc   :  { %158 = vst [vmem:[%s282_s3 + $0x18] sm:$0xff] %v154_v21 }
  0xfd   :  { %156 = vst [vmem:[%s282_s3 + $0x8] sm:$0xff] %v152_v22 }

</bundles_post_ra>
